<compile_context>
chip_gen: v5e
topology: v5e:2x2
jax: 0.10.0
libtpu: 0.0.40
codegen_flags: <defaults>
</compile_context>

<pallas_src>
import math

import jax
import jax.numpy as jnp
from jax import lax
from jax.experimental import pallas as pl
from jax.experimental.pallas import tpu as pltpu

_LANES = 128
_DEFAULT_TILE_ROWS_F32 = 16384   # 8 MiB per f32 input block
_MAX_CHUNK_ROWS = 1024           # bounds in-kernel f32 temporaries to ~2 MiB


def _round_up(x, m):
    return ((x + m - 1) // m) * m


def _pick_chunk(tile_r, step, cap=_MAX_CHUNK_ROWS):
    """Largest multiple-of-`step` divisor of tile_r that is <= cap."""
    if tile_r <= cap:
        return tile_r
    c = max(step, (cap // step) * step)
    while c >= step:
        if tile_r % c == 0:
            return c
        c -= step
    return tile_r  # fallback: single chunk (tile_r is always step-aligned here)


def _make_mse_kernel(total_rows, needs_mask, tile_r, chunk_rows, n_chunks):
    """Kernel producing one (1, 8, 128) f32 partial-sum slab per grid step."""

    def chunk_sum(x_blk, t_blk, row0, masked):
        x = x_blk.astype(jnp.float32)
        t = t_blk.astype(jnp.float32)
        d = x - t
        sq = d * d
        if masked:
            # (chunk, 1) iota -> broadcast compare; select (not multiply) so
            # OOB garbage (incl. NaN/Inf) past the array end is discarded.
            row = row0 + lax.broadcasted_iota(jnp.int32, (x_blk.shape[0], 1), 0)
            sq = jnp.where(row < total_rows, sq, 0.0)
        r = x_blk.shape[0]
        # Fold (r, 128) -> (8, 128): lane/sublane-aligned vreg adds only.
        return jnp.sum(sq.reshape(r // 8, 8, _LANES), axis=0)

    def kernel(x_ref, t_ref, o_ref):
        base = pl.program_id(0) * tile_r  # global row offset of this block

        def run(masked):
            if n_chunks == 1:
                acc = chunk_sum(x_ref[...], t_ref[...], base, masked)
            else:
                def body(c, acc):
                    r0 = pl.multiple_of(c * chunk_rows, 8)
                    return acc + chunk_sum(
                        x_ref[pl.ds(r0, chunk_rows), :],
                        t_ref[pl.ds(r0, chunk_rows), :],
                        base + r0, masked)
                acc = lax.fori_loop(0, n_chunks, body,
                                    jnp.zeros((8, _LANES), jnp.float32))
            o_ref[...] = acc.reshape(1, 8, _LANES)

        if needs_mask:
            last = pl.num_programs(0) - 1

            @pl.when(pl.program_id(0) != last)
            def _():
                run(False)

            @pl.when(pl.program_id(0) == last)
            def _():
                run(True)
        else:
            run(False)

    return kernel


def mse_loss(inputs, targets, *, tile_rows=_DEFAULT_TILE_ROWS_F32):
    """MSELoss.forward: mean((inputs - targets)**2) over all elements."""
    assert inputs.shape == targets.shape, (inputs.shape, targets.shape)
    n_elems = math.prod(inputs.shape)
    assert n_elems > 0

    out_dtype = jnp.promote_types(
        jnp.promote_types(inputs.dtype, targets.dtype), jnp.float32)

    x = inputs.reshape(-1)
    t = targets.reshape(-1)

    main = (n_elems // _LANES) * _LANES
    tail = n_elems - main

    # <128-element tail: handled with plain jnp (no extra HBM pass, no pad).
    tail_sum = jnp.float32(0.0)
    if tail:
        xt = x[main:].astype(jnp.float32)
        tt = t[main:].astype(jnp.float32)
        dt = xt - tt
        tail_sum = jnp.sum(dt * dt)

    if main == 0:
        total = tail_sum
    else:
        rows = main // _LANES
        x2 = x[:main].reshape(rows, _LANES)   # contiguous reshape: no HBM copy
        t2 = t[:main].reshape(rows, _LANES)

        x_item = jnp.dtype(inputs.dtype).itemsize
        t_item = jnp.dtype(targets.dtype).itemsize
        min_item = min(x_item, t_item)
        max_item = max(x_item, t_item)
        submul = 8 * max(1, 4 // min_item)    # native sublane multiple
        scale = max(1, 4 // max_item)         # keep ~8 MiB HBM traffic / block

        cap = max(submul, (tile_rows * scale) // submul * submul)
        tile_r = min(cap, _round_up(rows, submul))
        grid = pl.cdiv(rows, tile_r)
        needs_mask = (rows % tile_r) != 0

        chunk_rows = _pick_chunk(tile_r, submul)
        n_chunks = tile_r // chunk_rows

        kernel = _make_mse_kernel(rows, needs_mask, tile_r, chunk_rows, n_chunks)

        cost = pl.CostEstimate(
            flops=3 * main,                                   # sub, mul, add
            transcendentals=0,
            bytes_accessed=main * (x_item + t_item) + grid * 8 * _LANES * 4)

        partials = pl.pallas_call(
            kernel,
            out_shape=jax.ShapeDtypeStruct((grid, 8, _LANES), jnp.float32),
            grid=(grid,),
            in_specs=[
                pl.BlockSpec((tile_r, _LANES), lambda i: (i, 0)),
                pl.BlockSpec((tile_r, _LANES), lambda i: (i, 0)),
            ],
            # One independent (8,128) partial slab per grid step -> the axis is
            # "parallel" (megacore-shardable); combine below is trivial.
            out_specs=pl.BlockSpec((1, 8, _LANES), lambda i: (i, 0, 0)),
            compiler_params=pltpu.CompilerParams(
                dimension_semantics=("parallel",),
                vmem_limit_bytes=48 * 1024 * 1024),
            cost_estimate=cost,
        )(x2, t2)

        total = jnp.sum(partials) + tail_sum

    # NOTE: for n_elems > 2^24 the f32 divisor is rounded (~1e-7 relative);
    # acceptable vs torch which also reduces in the compute dtype.
    return (total / jnp.float32(n_elems)).astype(out_dtype)


def _reference_mse(inputs, targets):
    """Pure-JAX reference mirroring torch's ((input - target)**2).mean()."""
    x = inputs.astype(jnp.float32)
    t = targets.astype(jnp.float32)
    return jnp.mean((x - t) ** 2)


if __name__ == "__main__":
    key = jax.random.PRNGKey(0)
    k = jax.random.split(key, 10)

    # 1) Main case: lane-divisible element count, single full-extent tile.
    x = jax.random.normal(k[0], (2, 4, 16, 16), dtype=jnp.float32)
    t = jax.random.normal(k[1], (2, 4, 16, 16), dtype=jnp.float32)
    loss = jax.block_until_ready(mse_loss(x, t))
    ref = jax.block_until_ready(_reference_mse(x, t))
    assert jnp.allclose(loss, ref, rtol=1e-5, atol=1e-6), (loss, ref)

    # 2) Boundary-masking path: rows=12, tile_rows=8 -> grid=2, masked last tile.
    xb = jax.random.normal(k[2], (2, 4, 16, 12), dtype=jnp.float32)
    tb = jax.random.normal(k[3], (2, 4, 16, 12), dtype=jnp.float32)
    loss_b = jax.block_until_ready(mse_loss(xb, tb, tile_rows=8))
    ref_b = jax.block_until_ready(_reference_mse(xb, tb))
    assert jnp.allclose(loss_b, ref_b, rtol=1e-5, atol=1e-6), (loss_b, ref_b)

    # 3) n_elems < 128: pure jnp tail path (no pallas_call).
    xc = jax.random.normal(k[4], (3, 5, 7), dtype=jnp.float32)
    tc = jax.random.normal(k[5], (3, 5, 7), dtype=jnp.float32)
    loss_c = jax.block_until_ready(mse_loss(xc, tc))
    ref_c = jax.block_until_ready(_reference_mse(xc, tc))
    assert jnp.allclose(loss_c, ref_c, rtol=1e-5, atol=1e-6), (loss_c, ref_c)

    # 4) Non-128-divisible with a large prefix: kernel on prefix + jnp tail,
    #    and an in-kernel masked tile (rows=11 rounded up to a 16-row block).
    xd = jax.random.normal(k[6], (3, 5, 100), dtype=jnp.float32)
    td = jax.random.normal(k[7], (3, 5, 100), dtype=jnp.float32)
    loss_d = jax.block_until_ready(mse_loss(xd, td))
    ref_d = jax.block_until_ready(_reference_mse(xd, td))
    assert jnp.allclose(loss_d, ref_d, rtol=1e-5, atol=1e-6), (loss_d, ref_d)

    # 5) bf16 inputs: exercises dtype-aware sublane rounding + in-register upcast.
    xe = jax.random.normal(k[8], (2, 4, 16, 16), dtype=jnp.bfloat16)
    te = jax.random.normal(k[9], (2, 4, 16, 16), dtype=jnp.bfloat16)
    loss_e = jax.block_until_ready(mse_loss(xe, te))
    ref_e = jax.block_until_ready(_reference_mse(xe, te))
    assert jnp.allclose(loss_e.astype(jnp.float32), ref_e, rtol=1e-2, atol=1e-2), (
        loss_e, ref_e)

    print("KERNEL_OK")
</pallas_src>

<mosaic_0001>
module attributes {stable_mosaic.version = 11 : i64} {
  func.func @kernel(%arg0: i32, %arg1: memref<16x128xf32, #tpu.memory_space<vmem>>, %arg2: memref<16x128xf32, #tpu.memory_space<vmem>>, %arg3: memref<1x8x128xf32, #tpu.memory_space<vmem>>) attributes {dimension_semantics = [#tpu.dimension_semantics<parallel>], iteration_bounds = array<i64: 1>, scalar_prefetch = 0 : i64, scratch_operands = 0 : i64, tpu.core_type = #tpu.core_type<tc>, window_params = [{transform_indices = @transform_0, window_bounds = array<i64: 16, 128>}, {transform_indices = @transform_1, window_bounds = array<i64: 16, 128>}, {transform_indices = @transform_2, window_bounds = array<i64: 1, 8, 128>}]} {
    %c0 = arith.constant 0 : index
    %c0_0 = arith.constant 0 : index
    %0 = vector.load %arg1[%c0, %c0_0] : memref<16x128xf32, #tpu.memory_space<vmem>>, vector<16x128xf32>
    %c0_1 = arith.constant 0 : index
    %c0_2 = arith.constant 0 : index
    %1 = vector.load %arg2[%c0_1, %c0_2] : memref<16x128xf32, #tpu.memory_space<vmem>>, vector<16x128xf32>
    %2 = arith.subf %0, %1 : vector<16x128xf32>
    %3 = arith.mulf %2, %2 : vector<16x128xf32>
    %4 = vector.shape_cast %3 : vector<16x128xf32> to vector<2x8x128xf32>
    %cst = arith.constant dense<0.000000e+00> : vector<8x128xf32>
    %5 = vector.multi_reduction <add>, %4, %cst [0] : vector<2x8x128xf32> to vector<8x128xf32>
    %6 = vector.shape_cast %5 : vector<8x128xf32> to vector<1x8x128xf32>
    %c0_3 = arith.constant 0 : index
    %c0_4 = arith.constant 0 : index
    %c0_5 = arith.constant 0 : index
    %7 = vector.load %arg3[%c0_3, %c0_4, %c0_5] : memref<1x8x128xf32, #tpu.memory_space<vmem>>, vector<1x8x128xf32>
    tpu.vector_store %arg3[%c0_3, %c0_4, %c0_5], %6 {strides = array<i32>} : memref<1x8x128xf32, #tpu.memory_space<vmem>>, vector<1x8x128xf32>,
    return
  }
  func.func @transform_0(%arg0: i32) -> (i32, i32) {
    %c0_i32 = arith.constant 0 : i32
    %c0_i32_0 = arith.constant 0 : i32
    return %arg0, %c0_i32 : i32, i32
  }
  func.func @transform_1(%arg0: i32) -> (i32, i32) {
    %c0_i32 = arith.constant 0 : i32
    %c0_i32_0 = arith.constant 0 : i32
    return %arg0, %c0_i32 : i32, i32
  }
  func.func @transform_2(%arg0: i32) -> (i32, i32, i32) {
    %c0_i32 = arith.constant 0 : i32
    %c0_i32_0 = arith.constant 0 : i32
    %c0_i32_1 = arith.constant 0 : i32
    return %arg0, %c0_i32, %c0_i32_0 : i32, i32, i32
  }
}

</mosaic_0001>

<bundles_post_ra>
// kernel: tpu_custom_call.1
= control target key start
LH: loop header
LB: loop body
LE: loop exit
PB: predicated region body
PF: predicated region fallthrough
CT: control target
= control target key end

     0   :  { %7 = vsyncpa [#allocation3], 0  ;;  %s184_s0 = inlined_call_operand.hbm [shape: f32[16,128], index: 0, kind: input, shape index: {}]   ;;  %s185_s1 = inlined_call_operand.hbm [shape: f32[16,128], index: 1, kind: input, shape index: {}]   ;;  %s186_s2 = inlined_call_operand.hbm [shape: f32[1,8,128], index: 2, kind: output, shape index: {}]  }
   0x1   :  { %8 = vsyncpa [#allocation6], 0 }
   0x2   :  { %9 = vsyncpa [#allocation4], 0  ;;  %s14_s11 = sshll.u32 %s184_s0, 4  ;;  %s155_s12 = smov [#allocation2]   ;;  %s15_s11 = int_to_ptr.hbm [resolvable:$true] %s14_s11 }
   0x3   :  { %s16_s13 = sshll.u32 %s155_s12, 4  ;;  %s27_s16 = sshll.u32 %s185_s1, 4  ;;  %s17_s13 = int_to_ptr.vmem [resolvable:$true] %s16_s13  ;;  %s28_s16 = int_to_ptr.hbm [resolvable:$true] %s27_s16 }
   0x4   :  { %s156_s17 = smov 128   ;;  %s157_s18 = smov 8  }
   0x5   :  { %22 = dma.hbm_to_vmem [thread:$0]  %s15_s11, 256, %s17_s13, [#allocation3], %s156_s17, %s156_s17, %s157_s18  }
   0x6   :  { %s158_s19 = smov [#allocation5]  }
   0x7   :  { %s29_s20 = sshll.u32 %s158_s19, 4  ;;  %s30_s20 = int_to_ptr.vmem [resolvable:$true] %s29_s20 }
   0x8   :  { %35 = dma.hbm_to_vmem [thread:$0]  %s28_s16, 256, %s30_s20, [#allocation6], %s156_s17, %s156_s17, %s157_s18  }
   0x9   :  { %149 = dma.done.wait [#allocation3], 256  }
   0xa   :  { %150 = vsyncadd [#allocation3], 4294967040 }
   0xb   :  { %151 = dma.done.wait [#allocation6], 256  }
   0xc   :  { %152 = vsyncadd [#allocation6], 4294967040  ;;  %v44_v0 = vld [vmem:[#allocation2] sm:$0xff]  ;;  %v45_v1 = vld [vmem:[#allocation2 + $0x8] sm:$0xff]  ;;  %s159_s0 = smov [#allocation7]   ;;  %s61_s23 = sshll.u32 %s186_s2, 4  ;;  %s62_s23 = int_to_ptr.hbm [resolvable:$true] %s61_s23 }
   0xd   :  { %v46_v2 = vld [vmem:[#allocation5] sm:$0xff]  ;;  %v47_v3 = vld [vmem:[#allocation5 + $0x8] sm:$0xff]  ;;  %s59_s1 = sshll.u32 %s159_s0, 4  ;;  %s60_s1 = int_to_ptr.vmem [resolvable:$true] %s59_s1 }
   0xe   :  { %v48_v4 = vsub.f32 %v44_v0, %v46_v2  ;;  %v49_v5 = vsub.f32 %v45_v1, %v47_v3 }
  0x10   :  { %v50_v6 = vmul.f32 %v48_v4, %v48_v4  ;;  %v51_v7 = vmul.f32 %v49_v5, %v49_v5 }
  0x12   :  { %v52_v8 = vadd.f32 %v51_v7, %v50_v6 }
  0x14   :  { %53 = vst [vmem:[#allocation7] sm:$0xff] %v52_v8 }
  0x15   :  { %64 = dma.vmem_to_hbm [thread:$0]  %s60_s1, 128, %s62_s23, [#allocation4]  }
  0x16   :  { %153 = dma.done.wait [#allocation4], 128  }
  0x17   :  { %154 = vsyncadd [#allocation4], 4294967168 }
  0x18   :  { %69 = vsyncpa [#allocation3], 1 }
  0x19   :  { %70 = vsyncpa [#allocation6], 1 }
  0x1a   :  { %71 = vsyncpa [#allocation4], 1 }

</bundles_post_ra>
